<compile_context>
chip_gen: v5e
topology: v5e:2x2
jax: 0.10.0
libtpu: 0.0.40
codegen_flags: <defaults>
</compile_context>

<pallas_src>
import functools

import jax
import jax.numpy as jnp
from jax.experimental import pallas as pl
from jax.experimental.pallas import tpu as pltpu


def _round_up(n, m):
    return ((n + m - 1) // m) * m


def _cdiv(a, b):
    return (a + b - 1) // b


def _make_fused_mlp_kernel(num_layers, activation):
    """Fused MLP kernel: refs = (x, w1, b1, w2, b2, ..., wL, bL, out)."""

    def kernel(*refs):
        x_ref = refs[0]
        o_ref = refs[-1]
        h = x_ref[...]
        # Static (unrolled) layer loop; intermediates never leave VMEM/vregs.
        for i in range(num_layers):
            w = refs[1 + 2 * i][...]      # [G*IN_i, G*OUT_i] (block-diagonal)
            b = refs[2 + 2 * i][...]      # [1, G*OUT_i]
            # Explicit choice: default MXU precision (bf16 operands, f32 acc).
            h = jnp.dot(h, w, preferred_element_type=jnp.float32) + b
            if i < num_layers - 1:        # final layer has no activation
                if activation == "relu":
                    h = jnp.maximum(h, 0.0)
                else:
                    h = jnp.tanh(h)       # EUP slot; overlaps MXU/VPU for free
        o_ref[...] = h.astype(o_ref.dtype)

    return kernel


@functools.partial(jax.jit, static_argnames=("activation_fn", "block_batch"))
def mynet_forward(x, params, activation_fn="tanh", block_batch=8192):
    """Forward pass identical to MyNet.forward, as one fused pallas_call.

    x:      [B, input_size] float32
    params: list of (w_t, b) with w_t of shape (in, out) (PyTorch weight.T)
    """
    B, IN = x.shape
    num_layers = len(params)
    OUT = params[-1][0].shape[1]

    # ---- Row packing: fold G batch rows into the lane axis via block-diag W.
    # Pick the largest G in {1,2,4,8} that keeps every packed K/N dim <= 256.
    max_dim = IN
    for w_t, _ in params:
        max_dim = max(max_dim, w_t.shape[0], w_t.shape[1])
    G = 1
    while G < 8 and 2 * G * max_dim <= 256:
        G *= 2

    # ---- Batch tiling (in packed rows of G original rows each).
    Bp = _cdiv(B, G)                                # packed rows needed
    n_tiles = max(1, _cdiv(B, block_batch))
    if n_tiles < 2 and B >= 2048:
        n_tiles = 2                                 # keep both v7x TCs busy
    TBp = _round_up(_cdiv(Bp, n_tiles), 8)          # packed rows per tile
    Bp_pad = TBp * n_tiles
    B_pad = Bp_pad * G

    x_p = x if B_pad == B else jnp.pad(x, ((0, B_pad - B), (0, 0)))
    x_packed = x_p.reshape(Bp_pad, G * IN)          # free contiguous reshape

    flat_inputs = []
    in_specs = [pl.BlockSpec((TBp, G * IN), lambda i: (i, 0))]
    eye = jnp.eye(G, dtype=x.dtype)
    for w_t, b in params:
        wp = jnp.kron(eye, w_t) if G > 1 else w_t   # (G*in, G*out) block-diag
        bp = (jnp.tile(b, G) if G > 1 else b).reshape(1, -1)
        flat_inputs += [wp, bp]
        # Weights/biases: whole-array VMEM blocks, resident across batch tiles.
        in_specs += [
            pl.BlockSpec(wp.shape, lambda i: (0, 0)),
            pl.BlockSpec(bp.shape, lambda i: (0, 0)),
        ]

    kernel = _make_fused_mlp_kernel(num_layers, activation_fn)
    out_packed = pl.pallas_call(
        kernel,
        out_shape=jax.ShapeDtypeStruct((Bp_pad, G * OUT), jnp.float32),
        grid=(n_tiles,),
        in_specs=in_specs,
        # Last block dim == full array dim -> legal, and no lane padding in HBM.
        out_specs=pl.BlockSpec((TBp, G * OUT), lambda i: (i, 0)),
        compiler_params=pltpu.CompilerParams(
            dimension_semantics=("parallel",)),     # shards batch tiles on v7x
    )(x_packed, *flat_inputs)

    out = out_packed.reshape(B_pad, OUT)            # free contiguous reshape
    return out if B_pad == B else out[:B]


def init_mynet_params(key, input_size, num_hidden_layers, hidden_size, output_size):
    """Xavier-normal weights, bias filled with 0.01 (MyNet.xavier_initialize)."""
    params = []
    dims = [input_size] + [hidden_size] * num_hidden_layers
    keys = jax.random.split(key, num_hidden_layers + 1)
    for i in range(num_hidden_layers):
        fan_in, fan_out = dims[i], dims[i + 1]
        std = (2.0 / (fan_in + fan_out)) ** 0.5
        # PyTorch weight shape is (out, in); store transposed (in, out).
        w_t = std * jax.random.normal(keys[i], (fan_in, fan_out), dtype=jnp.float32)
        b = jnp.full((fan_out,), 0.01, dtype=jnp.float32)
        params.append((w_t, b))
    fan_in, fan_out = hidden_size, output_size
    std = (2.0 / (fan_in + fan_out)) ** 0.5
    w_t = std * jax.random.normal(keys[-1], (fan_in, fan_out), dtype=jnp.float32)
    b = jnp.full((fan_out,), 0.01, dtype=jnp.float32)
    params.append((w_t, b))
    return params


def _reference_forward(x, params, activation_fn="tanh"):
    act = jax.nn.relu if activation_fn == "relu" else jnp.tanh
    h = x
    for (w_t, b) in params[:-1]:
        h = act(h @ w_t + b)
    w_t, b = params[-1]
    return h @ w_t + b


# TODO(synk): train_model / predict / calculateErrors are host-side training &
# evaluation utilities, not kernel ops; only the forward pass is implemented.

if __name__ == "__main__":
    # Small shapes consistent with the module's constructor.
    batch = 8
    input_size = 16
    num_hidden_layers = 3
    hidden_size = 32
    output_size = 1

    key = jax.random.PRNGKey(0)
    k_x, k_p = jax.random.split(key)
    x = jax.random.normal(k_x, (batch, input_size), dtype=jnp.float32)
    params = init_mynet_params(k_p, input_size, num_hidden_layers,
                               hidden_size, output_size)

    out = mynet_forward(x, params, activation_fn="tanh")
    out = jax.block_until_ready(out)
    ref = _reference_forward(x, params, activation_fn="tanh")
    assert out.shape == (batch, output_size)
    assert jnp.allclose(out, ref, atol=2e-2, rtol=2e-2)

    # Multi-tile grid + relu path, uneven batch (exercises padding / tiling).
    x_mid = jax.random.normal(jax.random.fold_in(k_x, 1), (1000, input_size),
                              dtype=jnp.float32)
    out_mid = jax.block_until_ready(
        mynet_forward(x_mid, params, activation_fn="relu", block_batch=256))
    ref_mid = _reference_forward(x_mid, params, activation_fn="relu")
    assert out_mid.shape == (1000, output_size)
    assert jnp.allclose(out_mid, ref_mid, atol=2e-2, rtol=2e-2)

    # Large batch with default tiling (forces >=2 "parallel" grid steps).
    x_big = jax.random.normal(jax.random.fold_in(k_x, 2), (4096, input_size),
                              dtype=jnp.float32)
    out_big = jax.block_until_ready(mynet_forward(x_big, params))
    ref_big = _reference_forward(x_big, params)
    assert out_big.shape == (4096, output_size)
    assert jnp.allclose(out_big, ref_big, atol=2e-2, rtol=2e-2)

    print("KERNEL_OK")
</pallas_src>

<mosaic_0001>
module attributes {stable_mosaic.version = 11 : i64} {
  func.func @kernel(%arg0: i32, %arg1: memref<8x128xf32, #tpu.memory_space<vmem>>, %arg2: memref<128x256xf32, #tpu.memory_space<vmem>>, %arg3: memref<1x256xf32, #tpu.memory_space<vmem>>, %arg4: memref<256x256xf32, #tpu.memory_space<vmem>>, %arg5: memref<1x256xf32, #tpu.memory_space<vmem>>, %arg6: memref<256x256xf32, #tpu.memory_space<vmem>>, %arg7: memref<1x256xf32, #tpu.memory_space<vmem>>, %arg8: memref<256x8xf32, #tpu.memory_space<vmem>>, %arg9: memref<1x8xf32, #tpu.memory_space<vmem>>, %arg10: memref<8x8xf32, #tpu.memory_space<vmem>>) attributes {dimension_semantics = [#tpu.dimension_semantics<parallel>], iteration_bounds = array<i64: 1>, scalar_prefetch = 0 : i64, scratch_operands = 0 : i64, tpu.core_type = #tpu.core_type<tc>, window_params = [{transform_indices = @transform_0, window_bounds = array<i64: 8, 128>}, {pipeline_mode = #tpu.pipeline_mode<synchronous>, transform_indices = @transform_1, window_bounds = array<i64: 128, 256>}, {pipeline_mode = #tpu.pipeline_mode<synchronous>, transform_indices = @transform_2, window_bounds = array<i64: 1, 256>}, {pipeline_mode = #tpu.pipeline_mode<synchronous>, transform_indices = @transform_3, window_bounds = array<i64: 256, 256>}, {pipeline_mode = #tpu.pipeline_mode<synchronous>, transform_indices = @transform_4, window_bounds = array<i64: 1, 256>}, {pipeline_mode = #tpu.pipeline_mode<synchronous>, transform_indices = @transform_5, window_bounds = array<i64: 256, 256>}, {pipeline_mode = #tpu.pipeline_mode<synchronous>, transform_indices = @transform_6, window_bounds = array<i64: 1, 256>}, {pipeline_mode = #tpu.pipeline_mode<synchronous>, transform_indices = @transform_7, window_bounds = array<i64: 256, 8>}, {pipeline_mode = #tpu.pipeline_mode<synchronous>, transform_indices = @transform_8, window_bounds = array<i64: 1, 8>}, {transform_indices = @transform_9, window_bounds = array<i64: 8, 8>}]} {
    %c0 = arith.constant 0 : index
    %c0_0 = arith.constant 0 : index
    %0 = vector.load %arg1[%c0, %c0_0] : memref<8x128xf32, #tpu.memory_space<vmem>>, vector<8x128xf32>
    %c0_1 = arith.constant 0 : index
    %c0_2 = arith.constant 0 : index
    %1 = vector.load %arg2[%c0_1, %c0_2] : memref<128x256xf32, #tpu.memory_space<vmem>>, vector<128x256xf32>
    %c0_3 = arith.constant 0 : index
    %c0_4 = arith.constant 0 : index
    %2 = vector.load %arg3[%c0_3, %c0_4] : memref<1x256xf32, #tpu.memory_space<vmem>>, vector<1x256xf32>
    %cst = arith.constant dense<0.000000e+00> : vector<8x256xf32>
    %3 = tpu.matmul %0, %1, %cst {dimension_numbers = #tpu.dot_dimension_numbers<[1], [0], [0], [1], [0, 0, 1, 1], [], []>} : vector<8x128xf32>, vector<128x256xf32>, vector<8x256xf32> -> vector<8x256xf32>
    %4 = vector.broadcast %2 : vector<1x256xf32> to vector<8x256xf32>
    %5 = arith.addf %3, %4 : vector<8x256xf32>
    %6 = math.tanh %5 : vector<8x256xf32>
    %c0_5 = arith.constant 0 : index
    %c0_6 = arith.constant 0 : index
    %7 = vector.load %arg4[%c0_5, %c0_6] : memref<256x256xf32, #tpu.memory_space<vmem>>, vector<256x256xf32>
    %c0_7 = arith.constant 0 : index
    %c0_8 = arith.constant 0 : index
    %8 = vector.load %arg5[%c0_7, %c0_8] : memref<1x256xf32, #tpu.memory_space<vmem>>, vector<1x256xf32>
    %cst_9 = arith.constant dense<0.000000e+00> : vector<8x256xf32>
    %9 = tpu.matmul %6, %7, %cst_9 {dimension_numbers = #tpu.dot_dimension_numbers<[1], [0], [0], [1], [0, 0, 1, 1], [], []>} : vector<8x256xf32>, vector<256x256xf32>, vector<8x256xf32> -> vector<8x256xf32>
    %10 = vector.broadcast %8 : vector<1x256xf32> to vector<8x256xf32>
    %11 = arith.addf %9, %10 : vector<8x256xf32>
    %12 = math.tanh %11 : vector<8x256xf32>
    %c0_10 = arith.constant 0 : index
    %c0_11 = arith.constant 0 : index
    %13 = vector.load %arg6[%c0_10, %c0_11] : memref<256x256xf32, #tpu.memory_space<vmem>>, vector<256x256xf32>
    %c0_12 = arith.constant 0 : index
    %c0_13 = arith.constant 0 : index
    %14 = vector.load %arg7[%c0_12, %c0_13] : memref<1x256xf32, #tpu.memory_space<vmem>>, vector<1x256xf32>
    %cst_14 = arith.constant dense<0.000000e+00> : vector<8x256xf32>
    %15 = tpu.matmul %12, %13, %cst_14 {dimension_numbers = #tpu.dot_dimension_numbers<[1], [0], [0], [1], [0, 0, 1, 1], [], []>} : vector<8x256xf32>, vector<256x256xf32>, vector<8x256xf32> -> vector<8x256xf32>
    %16 = vector.broadcast %14 : vector<1x256xf32> to vector<8x256xf32>
    %17 = arith.addf %15, %16 : vector<8x256xf32>
    %18 = math.tanh %17 : vector<8x256xf32>
    %c0_15 = arith.constant 0 : index
    %c0_16 = arith.constant 0 : index
    %19 = vector.load %arg8[%c0_15, %c0_16] : memref<256x8xf32, #tpu.memory_space<vmem>>, vector<256x8xf32>
    %c0_17 = arith.constant 0 : index
    %c0_18 = arith.constant 0 : index
    %20 = vector.load %arg9[%c0_17, %c0_18] : memref<1x8xf32, #tpu.memory_space<vmem>>, vector<1x8xf32>
    %cst_19 = arith.constant dense<0.000000e+00> : vector<8x8xf32>
    %21 = tpu.matmul %18, %19, %cst_19 {dimension_numbers = #tpu.dot_dimension_numbers<[1], [0], [0], [1], [0, 0, 1, 1], [], []>} : vector<8x256xf32>, vector<256x8xf32>, vector<8x8xf32> -> vector<8x8xf32>
    %22 = vector.broadcast %20 : vector<1x8xf32> to vector<8x8xf32>
    %23 = arith.addf %21, %22 : vector<8x8xf32>
    %c0_20 = arith.constant 0 : index
    %c0_21 = arith.constant 0 : index
    %24 = vector.load %arg10[%c0_20, %c0_21] : memref<8x8xf32, #tpu.memory_space<vmem>>, vector<8x8xf32>
    tpu.vector_store %arg10[%c0_20, %c0_21], %23 {strides = array<i32>} : memref<8x8xf32, #tpu.memory_space<vmem>>, vector<8x8xf32>,
    return
  }
  func.func @transform_0(%arg0: i32) -> (i32, i32) {
    %c0_i32 = arith.constant 0 : i32
    %c0_i32_0 = arith.constant 0 : i32
    return %arg0, %c0_i32 : i32, i32
  }
  func.func @transform_1(%arg0: i32) -> (i32, i32) {
    %c0_i32 = arith.constant 0 : i32
    %c0_i32_0 = arith.constant 0 : i32
    %c0_i32_1 = arith.constant 0 : i32
    return %c0_i32, %c0_i32_0 : i32, i32
  }
  func.func @transform_2(%arg0: i32) -> (i32, i32) {
    %c0_i32 = arith.constant 0 : i32
    %c0_i32_0 = arith.constant 0 : i32
    %c0_i32_1 = arith.constant 0 : i32
    return %c0_i32, %c0_i32_0 : i32, i32
  }
  func.func @transform_3(%arg0: i32) -> (i32, i32) {
    %c0_i32 = arith.constant 0 : i32
    %c0_i32_0 = arith.constant 0 : i32
    %c0_i32_1 = arith.constant 0 : i32
    return %c0_i32, %c0_i32_0 : i32, i32
  }
  func.func @transform_4(%arg0: i32) -> (i32, i32) {
    %c0_i32 = arith.constant 0 : i32
    %c0_i32_0 = arith.constant 0 : i32
    %c0_i32_1 = arith.constant 0 : i32
    return %c0_i32, %c0_i32_0 : i32, i32
  }
  func.func @transform_5(%arg0: i32) -> (i32, i32) {
    %c0_i32 = arith.constant 0 : i32
    %c0_i32_0 = arith.constant 0 : i32
    %c0_i32_1 = arith.constant 0 : i32
    return %c0_i32, %c0_i32_0 : i32, i32
  }
  func.func @transform_6(%arg0: i32) -> (i32, i32) {
    %c0_i32 = arith.constant 0 : i32
    %c0_i32_0 = arith.constant 0 : i32
    %c0_i32_1 = arith.constant 0 : i32
    return %c0_i32, %c0_i32_0 : i32, i32
  }
  func.func @transform_7(%arg0: i32) -> (i32, i32) {
    %c0_i32 = arith.constant 0 : i32
    %c0_i32_0 = arith.constant 0 : i32
    %c0_i32_1 = arith.constant 0 : i32
    return %c0_i32, %c0_i32_0 : i32, i32
  }
  func.func @transform_8(%arg0: i32) -> (i32, i32) {
    %c0_i32 = arith.constant 0 : i32
    %c0_i32_0 = arith.constant 0 : i32
    %c0_i32_1 = arith.constant 0 : i32
    return %c0_i32, %c0_i32_0 : i32, i32
  }
  func.func @transform_9(%arg0: i32) -> (i32, i32) {
    %c0_i32 = arith.constant 0 : i32
    %c0_i32_0 = arith.constant 0 : i32
    return %arg0, %c0_i32 : i32, i32
  }
}

</mosaic_0001>

<bundles_post_ra>
// kernel: tile.24
= control target key start
LH: loop header
LB: loop body
LE: loop exit
PB: predicated region body
PF: predicated region fallthrough
CT: control target
= control target key end

     0   :  { %s7_s6 = smov 3  ;;  %s46_s9 = smov 96   ;;  %vm4_vm0 = vcmask 261120   ;;  %vm11_vm1 = vcmask 1048320   ;;  %vm18_vm2 = vcmask 785920   ;;  %vm25_vm3 = vcmask 523520   ;;  %s77_s0 = inlined_call_operand.vmem [shape: f32[8,32], index: 0, kind: input, shape index: {}]   ;;  %s78_s1 = inlined_call_operand.vmem [shape: f32[1,256], index: 1, kind: output, shape index: {}]  }
   0x1   :  { %v39_v0 = vld [vmem:[%s77_s0 + $0x3] ss:$4 sm:%s7_s6]   ;;  %s21_s10 = smov 3  ;;  %s14_s13 = smov 3 }
   0x2   :  { %9 = vrot.lane.b32.xlu0 %v39_v0, %s46_s9  ;;  %v41_v1 = vld [vmem:[%s77_s0 + $0x1] ss:$4 sm:%s21_s10]   ;;  %s47_s14 = smov 32   ;;  %s48_s17 = smov 64  }
   0x3   :  { %23 = vrot.lane.b32.xlu1 %v41_v1, %s47_s14  ;;  %v40_v2 = vld [vmem:[%s77_s0 + $0x2] ss:$4 sm:%s14_s13]   ;;  %s2_s18 = smov 3 }
   0x4   :  { %v3_v3 = vld [vmem:[%s77_s0] ss:$4 sm:%s2_s18]  }
   0x5   :  { %5 = vst.msk [vmem:[#allocation0] ss:$8 sm:$0x3] %vm4_vm0, %v3_v3  }
   0xa   :  { %16 = vrot.lane.b32.xlu0 %v40_v2, %s48_s17 }
  0x74   :  { %v10_v4 = vpop.permute.xlu0 %9  }
  0x75   :  { %12 = vst.msk [vmem:[#allocation0] ss:$8 sm:$0x3] %vm11_vm1, %v10_v4   ;;  %v24_v5 = vpop.permute.xlu1 %23  }
  0x7c   :  { %v17_v6 = vpop.permute.xlu0 %16  }
  0x7d   :  { %19 = vst.msk [vmem:[#allocation0] ss:$8 sm:$0x3] %vm18_vm2, %v17_v6  }
  0x7e   :  { %26 = vst.msk [vmem:[#allocation0] ss:$8 sm:$0x3] %vm25_vm3, %v24_v5  }
  0x85   :  { %v29_v7 = vld [vmem:[#allocation0] sm:$0x1]  ;;  %v34_v8 = vld [vmem:[#allocation0 + $0x8] sm:$0x1] }
  0x86   :  { %32 = vst [vmem:[%s78_s1] sm:$0x1] %v29_v7 }
  0x87   :  { %42 = vst [vmem:[%s78_s1 + $0x1] sm:$0x1] %v34_v8 }

// kernel: mynet_forward.1
= control target key start
LH: loop header
LB: loop body
LE: loop exit
PB: predicated region body
PF: predicated region fallthrough
CT: control target
= control target key end

     0   :  { %vm493_vm0 = vcmask 64512   ;;  %s1156_s1 = inlined_call_operand.vmem [shape: f32[128,256], index: 1, kind: input, shape index: {}]   ;;  %s1157_s3 = inlined_call_operand.vmem [shape: f32[256,256], index: 3, kind: input, shape index: {}]   ;;  %s1158_s0 = inlined_call_operand.vmem [shape: f32[8,128], index: 0, kind: input, shape index: {}]   ;;  %s1159_s5 = inlined_call_operand.vmem [shape: f32[256,256], index: 5, kind: input, shape index: {}]   ;;  %s1160_s2 = inlined_call_operand.vmem [shape: f32[1,256], index: 2, kind: input, shape index: {}]   ;;  %s1161_s7 = inlined_call_operand.vmem [shape: f32[256,8], index: 7, kind: input, shape index: {}]   ;;  %s1162_s4 = inlined_call_operand.vmem [shape: f32[1,256], index: 4, kind: input, shape index: {}]   ;;  %s1163_s6 = inlined_call_operand.vmem [shape: f32[1,256], index: 6, kind: input, shape index: {}]   ;;  %s1164_s8 = inlined_call_operand.vmem [shape: f32[1,8], index: 8, kind: input, shape index: {}]   ;;  %s1165_s9 = inlined_call_operand.vmem [shape: f32[8,8], index: 9, kind: output, shape index: {}]  }
   0x1   :  { %v63_v0 = vld [vmem:[%s1156_s1 + $0xf0] sm:$0xff]  ;;  %v61_v1 = vld [vmem:[%s1156_s1 + $0xe0] sm:$0xff]  ;;  %v64_v2 = vld [vmem:[%s1156_s1 + $0xf8] sm:$0xff] }
   0x2   :  { %71 = vmatpush.msra.mxu0 %v63_v0  ;;  %91 = vmatpush.msra.mxu1 %v64_v2  ;;  %v62_v3 = vld [vmem:[%s1156_s1 + $0xe8] sm:$0xff]  ;;  %v59_v4 = vld [vmem:[%s1156_s1 + $0xd0] sm:$0xff]  ;;  %v60_v5 = vld [vmem:[%s1156_s1 + $0xd8] sm:$0xff] }
   0x3   :  { %v57_v6 = vld [vmem:[%s1156_s1 + $0xc0] sm:$0xff]  ;;  %v58_v7 = vld [vmem:[%s1156_s1 + $0xc8] sm:$0xff]  ;;  %v55_v8 = vld [vmem:[%s1156_s1 + $0xb0] sm:$0xff] }
   0x4   :  { %72 = vmatpush.msra.mxu0 %v61_v1  ;;  %92 = vmatpush.msra.mxu1 %v62_v3  ;;  %v56_v9 = vld [vmem:[%s1156_s1 + $0xb8] sm:$0xff]  ;;  %v53_v10 = vld [vmem:[%s1156_s1 + $0xa0] sm:$0xff]  ;;  %v54_v11 = vld [vmem:[%s1156_s1 + $0xa8] sm:$0xff] }
   0x5   :  { %v51_v12 = vld [vmem:[%s1156_s1 + $0x90] sm:$0xff]  ;;  %v52_v13 = vld [vmem:[%s1156_s1 + $0x98] sm:$0xff]  ;;  %v141_v15 = vld [vmem:[%s1157_s3 + $0xe0] sm:$0xff] }
   0x6   :  { %73 = vmatpush.msra.mxu0 %v59_v4  ;;  %93 = vmatpush.msra.mxu1 %v60_v5  ;;  %v143_v14 = vld [vmem:[%s1157_s3 + $0xf0] sm:$0xff]  ;;  %v49_v16 = vld [vmem:[%s1156_s1 + $0x80] sm:$0xff]  ;;  %v50_v17 = vld [vmem:[%s1156_s1 + $0x88] sm:$0xff] }
   0x7   :  { %183 = vmatpush.msra.mxu2 %v143_v14  ;;  %v175_v18 = vld [vmem:[%s1157_s3 + $0x1f0] sm:$0xff]  ;;  %v173_v20 = vld [vmem:[%s1157_s3 + $0x1e0] sm:$0xff]  ;;  %v48_v22 = vld [vmem:[%s1156_s1 + $0x78] sm:$0xff] }
   0x8   :  { %74 = vmatpush.msra.mxu0 %v57_v6  ;;  %94 = vmatpush.msra.mxu1 %v58_v7  ;;  %v139_v19 = vld [vmem:[%s1157_s3 + $0xd0] sm:$0xff]  ;;  %v137_v23 = vld [vmem:[%s1157_s3 + $0xc0] sm:$0xff]  ;;  %v46_v26 = vld [vmem:[%s1156_s1 + $0x68] sm:$0xff] }
   0x9   :  { %v47_v21 = vld [vmem:[%s1156_s1 + $0x70] sm:$0xff]  ;;  %184 = vmatpush.msra.mxu2 %v141_v15  ;;  %203 = vmatpush.msra.mxu3 %v175_v18  ;;  %v45_v25 = vld [vmem:[%s1156_s1 + $0x60] sm:$0xff]  ;;  %v44_v30 = vld [vmem:[%s1156_s1 + $0x58] sm:$0xff] }
   0xa   :  { %75 = vmatpush.msra.mxu0 %v55_v8  ;;  %95 = vmatpush.msra.mxu1 %v56_v9  ;;  %v171_v24 = vld [vmem:[%s1157_s3 + $0x1d0] sm:$0xff]  ;;  %v169_v28 = vld [vmem:[%s1157_s3 + $0x1c0] sm:$0xff]  ;;  %v42_v34 = vld [vmem:[%s1156_s1 + $0x48] sm:$0xff] }
   0xb   :  { %185 = vmatpush.msra.mxu2 %v139_v19  ;;  %204 = vmatpush.msra.mxu3 %v173_v20  ;;  %v135_v27 = vld [vmem:[%s1157_s3 + $0xb0] sm:$0xff]  ;;  %v133_v31 = vld [vmem:[%s1157_s3 + $0xa0] sm:$0xff]  ;;  %v40_v38 = vld [vmem:[%s1156_s1 + $0x38] sm:$0xff] }
   0xc   :  { %76 = vmatpush.msra.mxu0 %v53_v10  ;;  %96 = vmatpush.msra.mxu1 %v54_v11  ;;  %v43_v29 = vld [vmem:[%s1156_s1 + $0x50] sm:$0xff]  ;;  %v41_v33 = vld [vmem:[%s1156_s1 + $0x40] sm:$0xff]  ;;  %v38_v42 = vld [vmem:[%s1156_s1 + $0x28] sm:$0xff] }
   0xd   :  { %186 = vmatpush.msra.mxu2 %v137_v23  ;;  %205 = vmatpush.msra.mxu3 %v171_v24  ;;  %v167_v32 = vld [vmem:[%s1157_s3 + $0x1b0] sm:$0xff]  ;;  %v165_v36 = vld [vmem:[%s1157_s3 + $0x1a0] sm:$0xff]  ;;  %v36_v46 = vld [vmem:[%s1156_s1 + $0x18] sm:$0xff] }
   0xe   :  { %77 = vmatpush.msra.mxu0 %v51_v12  ;;  %97 = vmatpush.msra.mxu1 %v52_v13  ;;  %v131_v35 = vld [vmem:[%s1157_s3 + $0x90] sm:$0xff]  ;;  %v129_v39 = vld [vmem:[%s1157_s3 + $0x80] sm:$0xff]  ;;  %v34_v50 = vld [vmem:[%s1156_s1 + $0x8] sm:$0xff] }
   0xf   :  { %187 = vmatpush.msra.mxu2 %v135_v27  ;;  %206 = vmatpush.msra.mxu3 %v169_v28  ;;  %v39_v37 = vld [vmem:[%s1156_s1 + $0x30] sm:$0xff]  ;;  %v37_v41 = vld [vmem:[%s1156_s1 + $0x20] sm:$0xff]  ;;  %v144_v52 = vld [vmem:[%s1157_s3 + $0xf8] sm:$0xff] }
  0x10   :  { %78 = vmatpush.msra.mxu0 %v49_v16  ;;  %98 = vmatpush.msra.mxu1 %v50_v17  ;;  %v163_v40 = vld [vmem:[%s1157_s3 + $0x190] sm:$0xff]  ;;  %v161_v44 = vld [vmem:[%s1157_s3 + $0x180] sm:$0xff]  ;;  %v176_v53 = vld [vmem:[%s1157_s3 + $0x1f8] sm:$0xff] }
  0x11   :  { %188 = vmatpush.msra.mxu2 %v133_v31  ;;  %207 = vmatpush.msra.mxu3 %v167_v32  ;;  %v127_v43 = vld [vmem:[%s1157_s3 + $0x70] sm:$0xff]  ;;  %v125_v47 = vld [vmem:[%s1157_s3 + $0x60] sm:$0xff]  ;;  %v142_v56 = vld [vmem:[%s1157_s3 + $0xe8] sm:$0xff] }
  0x12   :  { %79 = vmatpush.msra.mxu0 %v47_v21  ;;  %99 = vmatpush.msra.mxu1 %v48_v22  ;;  %v35_v45 = vld [vmem:[%s1156_s1 + $0x10] sm:$0xff]  ;;  %v33_v49 = vld [vmem:[%s1156_s1] sm:$0xff]  ;;  %v174_v57 = vld [vmem:[%s1157_s3 + $0x1e8] sm:$0xff] }
  0x13   :  { %189 = vmatpush.msra.mxu2 %v131_v35  ;;  %208 = vmatpush.msra.mxu3 %v165_v36  ;;  %v159_v48 = vld [vmem:[%s1157_s3 + $0x170] sm:$0xff]  ;;  %v32_v51 = vld [vmem:[%s1158_s0] sm:$0xff]  ;;  %v140_v58 = vld [vmem:[%s1157_s3 + $0xd8] sm:$0xff] }
  0x14   :  { %80 = vmatpush.msra.mxu0 %v45_v25  ;;  %100 = vmatpush.msra.mxu1 %v46_v26  ;;  %v123_v54 = vld [vmem:[%s1157_s3 + $0x50] sm:$0xff]  ;;  %v157_v55 = vld [vmem:[%s1157_s3 + $0x160] sm:$0xff]  ;;  %v172_v59 = vld [vmem:[%s1157_s3 + $0x1d8] sm:$0xff] }
  0x15   :  { %190 = vmatpush.msra.mxu2 %v129_v39  ;;  %209 = vmatpush.msra.mxu3 %v163_v40  ;;  %v138_v60 = vld [vmem:[%s1157_s3 + $0xc8] sm:$0xff]  ;;  %v136_v62 = vld [vmem:[%s1157_s3 + $0xb8] sm:$0xff]  ;;  %v121_v11 = vld [vmem:[%s1157_s3 + $0x40] sm:$0xff] }
  0x16   :  { %81 = vmatpush.msra.mxu0 %v43_v29  ;;  %101 = vmatpush.msra.mxu1 %v44_v30  ;;  %v170_v61 = vld [vmem:[%s1157_s3 + $0x1c8] sm:$0xff]  ;;  %v168_v63 = vld [vmem:[%s1157_s3 + $0x1b8] sm:$0xff]  ;;  %v155_v12 = vld [vmem:[%s1157_s3 + $0x150] sm:$0xff] }
  0x17   :  { %191 = vmatpush.msra.mxu2 %v127_v43  ;;  %210 = vmatpush.msra.mxu3 %v161_v44  ;;  %v134_v0 = vld [vmem:[%s1157_s3 + $0xa8] sm:$0xff]  ;;  %v132_v2 = vld [vmem:[%s1157_s3 + $0x98] sm:$0xff]  ;;  %v119_v15 = vld [vmem:[%s1157_s3 + $0x30] sm:$0xff] }
  0x18   :  { %82 = vmatpush.msra.mxu0 %v41_v33  ;;  %102 = vmatpush.msra.mxu1 %v42_v34  ;;  %v166_v1 = vld [vmem:[%s1157_s3 + $0x1a8] sm:$0xff]  ;;  %v164_v3 = vld [vmem:[%s1157_s3 + $0x198] sm:$0xff]  ;;  %v153_v16 = vld [vmem:[%s1157_s3 + $0x140] sm:$0xff] }
  0x19   :  { %192 = vmatpush.msra.mxu2 %v125_v47  ;;  %211 = vmatpush.msra.mxu3 %v159_v48  ;;  %v130_v4 = vld [vmem:[%s1157_s3 + $0x88] sm:$0xff]  ;;  %v128_v6 = vld [vmem:[%s1157_s3 + $0x78] sm:$0xff]  ;;  %v117_v19 = vld [vmem:[%s1157_s3 + $0x20] sm:$0xff] }
  0x1a   :  { %83 = vmatpush.msra.mxu0 %v39_v37  ;;  %103 = vmatpush.msra.mxu1 %v40_v38  ;;  %v162_v5 = vld [vmem:[%s1157_s3 + $0x188] sm:$0xff]  ;;  %v160_v7 = vld [vmem:[%s1157_s3 + $0x178] sm:$0xff]  ;;  %v151_v20 = vld [vmem:[%s1157_s3 + $0x130] sm:$0xff] }
  0x1b   :  { %193 = vmatpush.msra.mxu2 %v123_v54  ;;  %212 = vmatpush.msra.mxu3 %v157_v55  ;;  %v126_v8 = vld [vmem:[%s1157_s3 + $0x68] sm:$0xff]  ;;  %v124_v10 = vld [vmem:[%s1157_s3 + $0x58] sm:$0xff]  ;;  %v115_v23 = vld [vmem:[%s1157_s3 + $0x10] sm:$0xff] }
  0x1c   :  { %84 = vmatpush.msra.mxu0 %v37_v41  ;;  %104 = vmatpush.msra.mxu1 %v38_v42  ;;  %v158_v9 = vld [vmem:[%s1157_s3 + $0x168] sm:$0xff]  ;;  %v156_v14 = vld [vmem:[%s1157_s3 + $0x158] sm:$0xff]  ;;  %v149_v24 = vld [vmem:[%s1157_s3 + $0x120] sm:$0xff] }
  0x1d   :  { %v122_v13 = vld [vmem:[%s1157_s3 + $0x48] sm:$0xff]  ;;  %194 = vmatpush.msra.mxu2 %v121_v11  ;;  %213 = vmatpush.msra.mxu3 %v155_v12  ;;  %v120_v17 = vld [vmem:[%s1157_s3 + $0x38] sm:$0xff]  ;;  %v113_v27 = vld [vmem:[%s1157_s3] sm:$0xff] }
  0x1e   :  { %85 = vmatpush.msra.mxu0 %v35_v45  ;;  %105 = vmatpush.msra.mxu1 %v36_v46  ;;  %v154_v18 = vld [vmem:[%s1157_s3 + $0x148] sm:$0xff]  ;;  %v152_v22 = vld [vmem:[%s1157_s3 + $0x138] sm:$0xff]  ;;  %v147_v28 = vld [vmem:[%s1157_s3 + $0x110] sm:$0xff] }
  0x1f   :  { %195 = vmatpush.msra.mxu2 %v119_v15  ;;  %214 = vmatpush.msra.mxu3 %v153_v16  ;;  %v118_v21 = vld [vmem:[%s1157_s3 + $0x28] sm:$0xff]  ;;  %v116_v25 = vld [vmem:[%s1157_s3 + $0x18] sm:$0xff]  ;;  %v145_v31 = vld [vmem:[%s1157_s3 + $0x100] sm:$0xff] }
  0x20   :  { %86 = vmatpush.msra.mxu0 %v33_v49  ;;  %106 = vmatpush.msra.mxu1 %v34_v50  ;;  %v150_v26 = vld [vmem:[%s1157_s3 + $0x128] sm:$0xff]  ;;  %v148_v30 = vld [vmem:[%s1157_s3 + $0x118] sm:$0xff]  ;;  %v327_v33 = vld [vmem:[%s1159_s5 + $0x1f0] sm:$0xff] }
  0x21   :  { %87 = vmatmul.f32.vlgmr.msra.gmra.mxu0 %v32_v51  ;;  %107 = vmatmul.f32.vlgmr.msra.gmra.mxu1 %v32_v51  ;;  %v114_v29 = vld [vmem:[%s1157_s3 + $0x8] sm:$0xff]  ;;  %v328_v34 = vld [vmem:[%s1159_s5 + $0x1f8] sm:$0xff]  ;;  %v325_v35 = vld [vmem:[%s1159_s5 + $0x1e0] sm:$0xff] }
  0x22   :  { %223 = vmatpush.msrb.mxu0 %v144_v52  ;;  %243 = vmatpush.msrb.mxu1 %v176_v53  ;;  %v146_v32 = vld [vmem:[%s1157_s3 + $0x108] sm:$0xff]  ;;  %v323_v37 = vld [vmem:[%s1159_s5 + $0x1d0] sm:$0xff]  ;;  %v296_v39 = vld [vmem:[%s1159_s5 + $0xf8] sm:$0xff] }
  0x23   :  { %196 = vmatpush.msra.mxu2 %v117_v19  ;;  %215 = vmatpush.msra.mxu3 %v151_v20  ;;  %v326_v36 = vld [vmem:[%s1159_s5 + $0x1e8] sm:$0xff]  ;;  %v295_v38 = vld [vmem:[%s1159_s5 + $0xf0] sm:$0xff]  ;;  %v324_v40 = vld [vmem:[%s1159_s5 + $0x1d8] sm:$0xff] }
  0x24   :  { %224 = vmatpush.msrb.mxu0 %v142_v56  ;;  %244 = vmatpush.msrb.mxu1 %v174_v57  ;;  %v293_v41 = vld [vmem:[%s1159_s5 + $0xe0] sm:$0xff]  ;;  %v294_v43 = vld [vmem:[%s1159_s5 + $0xe8] sm:$0xff]  ;;  %v291_v44 = vld [vmem:[%s1159_s5 + $0xd0] sm:$0xff] }
  0x25   :  { %197 = vmatpush.msra.mxu2 %v115_v23  ;;  %216 = vmatpush.msra.mxu3 %v149_v24  ;;  %v321_v42 = vld [vmem:[%s1159_s5 + $0x1c0] sm:$0xff]  ;;  %v322_v45 = vld [vmem:[%s1159_s5 + $0x1c8] sm:$0xff]  ;;  %v292_v46 = vld [vmem:[%s1159_s5 + $0xd8] sm:$0xff] }
  0x26   :  { %225 = vmatpush.msrb.mxu0 %v140_v58  ;;  %245 = vmatpush.msrb.mxu1 %v172_v59  ;;  %v319_v47 = vld [vmem:[%s1159_s5 + $0x1b0] sm:$0xff]  ;;  %v289_v48 = vld [vmem:[%s1159_s5 + $0xc0] sm:$0xff]  ;;  %v320_v49 = vld [vmem:[%s1159_s5 + $0x1b8] sm:$0xff] }
  0x27   :  { %198 = vmatpush.msra.mxu2 %v113_v27  ;;  %217 = vmatpush.msra.mxu3 %v147_v28  ;;  %v290_v50 = vld [vmem:[%s1159_s5 + $0xc8] sm:$0xff]  ;;  %v317_v51 = vld [vmem:[%s1159_s5 + $0x1a0] sm:$0xff]  ;;  %v287_v52 = vld [vmem:[%s1159_s5 + $0xb0] sm:$0xff] }
  0x28   :  { %226 = vmatpush.msrb.mxu0 %v138_v60  ;;  %246 = vmatpush.msrb.mxu1 %v170_v61  ;;  %v318_v53 = vld [vmem:[%s1159_s5 + $0x1a8] sm:$0xff]  ;;  %v288_v54 = vld [vmem:[%s1159_s5 + $0xb8] sm:$0xff]  ;;  %v315_v55 = vld [vmem:[%s1159_s5 + $0x190] sm:$0xff] }
  0x29   :  { %218 = vmatpush.msra.mxu3 %v145_v31  ;;  %335 = vmatpush.msrb.mxu2 %v295_v38  ;;  %v285_v56 = vld [vmem:[%s1159_s5 + $0xa0] sm:$0xff]  ;;  %v316_v57 = vld [vmem:[%s1159_s5 + $0x198] sm:$0xff]  ;;  %v286_v58 = vld [vmem:[%s1159_s5 + $0xa8] sm:$0xff] }
  0x2a   :  { %227 = vmatpush.msrb.mxu0 %v136_v62  ;;  %247 = vmatpush.msrb.mxu1 %v168_v63  ;;  %v313_v59 = vld [vmem:[%s1159_s5 + $0x180] sm:$0xff]  ;;  %v283_v60 = vld [vmem:[%s1159_s5 + $0x90] sm:$0xff]  ;;  %v314_v61 = vld [vmem:[%s1159_s5 + $0x188] sm:$0xff] }
  0x2b   :  { %355 = vmatpush.msrb.mxu3 %v327_v33  ;;  %336 = vmatpush.msrb.mxu2 %v293_v41  ;;  %v284_v62 = vld [vmem:[%s1159_s5 + $0x98] sm:$0xff]  ;;  %v311_v63 = vld [vmem:[%s1159_s5 + $0x170] sm:$0xff]  ;;  %v281_v12 = vld [vmem:[%s1159_s5 + $0x80] sm:$0xff] }
  0x2c   :  { %228 = vmatpush.msrb.mxu0 %v134_v0  ;;  %248 = vmatpush.msrb.mxu1 %v166_v1  ;;  %v65_v0 = vld [vmem:[%s1160_s2] sm:$0x3]  ;;  %v312_v1 = vld [vmem:[%s1159_s5 + $0x178] sm:$0xff]  ;;  %v279_v16 = vld [vmem:[%s1159_s5 + $0x70] sm:$0xff] }
  0x2d   :  { %356 = vmatpush.msrb.mxu3 %v325_v35  ;;  %337 = vmatpush.msrb.mxu2 %v291_v44  ;;  %v308_v15 = vld [vmem:[%s1159_s5 + $0x158] sm:$0xff]  ;;  %v306_v19 = vld [vmem:[%s1159_s5 + $0x148] sm:$0xff]  ;;  %v277_v20 = vld [vmem:[%s1159_s5 + $0x60] sm:$0xff] }
  0x2e   :  { %229 = vmatpush.msrb.mxu0 %v132_v2  ;;  %249 = vmatpush.msrb.mxu1 %v164_v3  ;;  %v309_v2 = vld [vmem:[%s1159_s5 + $0x160] sm:$0xff]  ;;  %v310_v3 = vld [vmem:[%s1159_s5 + $0x168] sm:$0xff]  ;;  %v304_v23 = vld [vmem:[%s1159_s5 + $0x138] sm:$0xff] }
  0x2f   :  { %357 = vmatpush.msrb.mxu3 %v323_v37  ;;  %338 = vmatpush.msrb.mxu2 %v289_v48  ;;  %v275_v24 = vld [vmem:[%s1159_s5 + $0x50] sm:$0xff]  ;;  %v302_v27 = vld [vmem:[%s1159_s5 + $0x128] sm:$0xff]  ;;  %v273_v28 = vld [vmem:[%s1159_s5 + $0x40] sm:$0xff] }
  0x30   :  { %230 = vmatpush.msrb.mxu0 %v130_v4  ;;  %250 = vmatpush.msrb.mxu1 %v162_v5  ;;  %v67_v4 = vperm.slane %v65_v0, 0  ;;  %v68_v5 = vperm.slane %v65_v0, 1  ;;  %v300_v31 = vld [vmem:[%s1159_s5 + $0x118] sm:$0xff]  ;;  %v297_v33 = vld [vmem:[%s1159_s5 + $0x100] sm:$0xff]  ;;  %v298_v35 = vld [vmem:[%s1159_s5 + $0x108] sm:$0xff] }
  0x31   :  { %358 = vmatpush.msrb.mxu3 %v321_v42  ;;  %339 = vmatpush.msrb.mxu2 %v287_v52  ;;  %v270_v37 = vld [vmem:[%s1159_s5 + $0x28] sm:$0xff]  ;;  %v267_v38 = vld [vmem:[%s1159_s5 + $0x10] sm:$0xff]  ;;  %v448_v42 = vld [vmem:[%s1161_s7 + $0xf8] sm:$0xff] }
  0x32   :  { %231 = vmatpush.msrb.mxu0 %v128_v6  ;;  %251 = vmatpush.msrb.mxu1 %v160_v7  ;;  %v266_v41 = vld [vmem:[%s1159_s5 + $0x8] sm:$0xff]  ;;  %v432_v44 = vld [vmem:[%s1161_s7 + $0x78] sm:$0xff]  ;;  %v445_v48 = vld [vmem:[%s1161_s7 + $0xe0] sm:$0xff] }
  0x33   :  { %359 = vmatpush.msrb.mxu3 %v319_v47  ;;  %340 = vmatpush.msrb.mxu2 %v285_v56  ;;  %v430_v47 = vld [vmem:[%s1161_s7 + $0x68] sm:$0xff]  ;;  %v443_v52 = vld [vmem:[%s1161_s7 + $0xd0] sm:$0xff] }
  0x34   :  { %232 = vmatpush.msrb.mxu0 %v126_v8  ;;  %252 = vmatpush.msrb.mxu1 %v158_v9 }
  0x35   :  { %360 = vmatpush.msrb.mxu3 %v317_v51  ;;  %341 = vmatpush.msrb.mxu2 %v283_v60  ;;  %v177_v51 = vld [vmem:[%s1162_s4] sm:$0x3] }
  0x36   :  { %233 = vmatpush.msrb.mxu0 %v124_v10  ;;  %253 = vmatpush.msrb.mxu1 %v156_v14  ;;  %v282_v14 = vld [vmem:[%s1159_s5 + $0x88] sm:$0xff] }
  0x37   :  { %361 = vmatpush.msrb.mxu3 %v315_v55  ;;  %342 = vmatpush.msrb.mxu2 %v281_v12  ;;  %v423_v12 = vld [vmem:[%s1161_s7 + $0x30] sm:$0xff] }
  0x38   :  { %234 = vmatpush.msrb.mxu0 %v122_v13  ;;  %254 = vmatpush.msrb.mxu1 %v154_v18  ;;  %v307_v13 = vld [vmem:[%s1159_s5 + $0x150] sm:$0xff]  ;;  %v280_v18 = vld [vmem:[%s1159_s5 + $0x78] sm:$0xff] }
  0x39   :  { %362 = vmatpush.msrb.mxu3 %v313_v59  ;;  %343 = vmatpush.msrb.mxu2 %v279_v16  ;;  %v179_v59 = vperm.slane %v177_v51, 0  ;;  %v421_v16 = vld [vmem:[%s1161_s7 + $0x20] sm:$0xff] }
  0x3a   :  { %235 = vmatpush.msrb.mxu0 %v120_v17  ;;  %255 = vmatpush.msrb.mxu1 %v152_v22  ;;  %v305_v17 = vld [vmem:[%s1159_s5 + $0x140] sm:$0xff]  ;;  %v278_v22 = vld [vmem:[%s1159_s5 + $0x68] sm:$0xff] }
  0x3b   :  { %363 = vmatpush.msrb.mxu3 %v311_v63  ;;  %344 = vmatpush.msrb.mxu2 %v277_v20  ;;  %v419_v20 = vld [vmem:[%s1161_s7 + $0x10] sm:$0xff] }
  0x3c   :  { %236 = vmatpush.msrb.mxu0 %v118_v21  ;;  %256 = vmatpush.msrb.mxu1 %v150_v26  ;;  %v303_v21 = vld [vmem:[%s1159_s5 + $0x130] sm:$0xff]  ;;  %v276_v26 = vld [vmem:[%s1159_s5 + $0x58] sm:$0xff] }
  0x3d   :  { %364 = vmatpush.msrb.mxu3 %v309_v2  ;;  %345 = vmatpush.msrb.mxu2 %v275_v24  ;;  %v428_v2 = vld [vmem:[%s1161_s7 + $0x58] sm:$0xff] }
  0x3e   :  { %237 = vmatpush.msrb.mxu0 %v116_v25  ;;  %257 = vmatpush.msrb.mxu1 %v148_v30  ;;  %v301_v25 = vld [vmem:[%s1159_s5 + $0x120] sm:$0xff]  ;;  %v274_v30 = vld [vmem:[%s1159_s5 + $0x48] sm:$0xff] }
  0x3f   :  { %365 = vmatpush.msrb.mxu3 %v307_v13  ;;  %346 = vmatpush.msrb.mxu2 %v273_v28  ;;  %v436_v13 = vld [vmem:[%s1161_s7 + $0x98] sm:$0xff] }
  0x40   :  { %238 = vmatpush.msrb.mxu0 %v114_v29  ;;  %258 = vmatpush.msrb.mxu1 %v146_v32  ;;  %v299_v29 = vld [vmem:[%s1159_s5 + $0x110] sm:$0xff] }
  0x41   :  { %366 = vmatpush.msrb.mxu3 %v305_v17  ;;  %v271_v32 = vld [vmem:[%s1159_s5 + $0x30] sm:$0xff]  ;;  %v434_v17 = vld [vmem:[%s1161_s7 + $0x88] sm:$0xff] }
  0x42   :  { %395 = vmatpush.msra.mxu1 %v328_v34  ;;  %375 = vmatpush.msra.mxu0 %v296_v39  ;;  %v272_v34 = vld [vmem:[%s1159_s5 + $0x38] sm:$0xff] }
  0x43   :  { %367 = vmatpush.msrb.mxu3 %v303_v21  ;;  %347 = vmatpush.msrb.mxu2 %v271_v32  ;;  %v268_v39 = vld [vmem:[%s1159_s5 + $0x18] sm:$0xff]  ;;  %v418_v21 = vld [vmem:[%s1161_s7 + $0x8] sm:$0xff] }
  0x44   :  { %396 = vmatpush.msra.mxu1 %v326_v36  ;;  %376 = vmatpush.msra.mxu0 %v294_v43  ;;  %v269_v36 = vld [vmem:[%s1159_s5 + $0x20] sm:$0xff]  ;;  %v447_v43 = vld [vmem:[%s1161_s7 + $0xf0] sm:$0xff] }
  0x45   :  { %368 = vmatpush.msrb.mxu3 %v301_v25  ;;  %348 = vmatpush.msrb.mxu2 %v269_v36  ;;  %v499_v36 = vld [vmem:[%s1164_s8] ss:$0 sm:$0xff] }
  0x46   :  { %397 = vmatpush.msra.mxu1 %v324_v40  ;;  %377 = vmatpush.msra.mxu0 %v292_v46  ;;  %v265_v40 = vld [vmem:[%s1159_s5] sm:$0xff]  ;;  %v446_v46 = vld [vmem:[%s1161_s7 + $0xe8] sm:$0xff] }
  0x47   :  { %369 = vmatpush.msrb.mxu3 %v299_v29  ;;  %349 = vmatpush.msrb.mxu2 %v267_v38 }
  0x48   :  { %398 = vmatpush.msra.mxu1 %v322_v45  ;;  %378 = vmatpush.msra.mxu0 %v290_v50  ;;  %v431_v45 = vld [vmem:[%s1161_s7 + $0x70] sm:$0xff]  ;;  %v444_v50 = vld [vmem:[%s1161_s7 + $0xd8] sm:$0xff] }
  0x49   :  { %370 = vmatpush.msrb.mxu3 %v297_v33  ;;  %350 = vmatpush.msrb.mxu2 %v265_v40 }
  0x4a   :  { %399 = vmatpush.msra.mxu1 %v320_v49  ;;  %379 = vmatpush.msra.mxu0 %v288_v54  ;;  %v429_v49 = vld [vmem:[%s1161_s7 + $0x60] sm:$0xff]  ;;  %v180_v54 = vperm.slane %v177_v51, 1 }
  0x4c   :  { %400 = vmatpush.msra.mxu1 %v318_v53  ;;  %380 = vmatpush.msra.mxu0 %v286_v58  ;;  %v442_v53 = vld [vmem:[%s1161_s7 + $0xc8] sm:$0xff] }
  0x4e   :  { %401 = vmatpush.msra.mxu1 %v316_v57  ;;  %381 = vmatpush.msra.mxu0 %v284_v62 }
  0x50   :  { %402 = vmatpush.msra.mxu1 %v314_v61  ;;  %382 = vmatpush.msra.mxu0 %v282_v14  ;;  %v422_v14 = vld [vmem:[%s1161_s7 + $0x28] sm:$0xff] }
  0x52   :  { %403 = vmatpush.msra.mxu1 %v312_v1  ;;  %383 = vmatpush.msra.mxu0 %v280_v18  ;;  %v420_v18 = vld [vmem:[%s1161_s7 + $0x18] sm:$0xff] }
  0x54   :  { %404 = vmatpush.msra.mxu1 %v310_v3  ;;  %384 = vmatpush.msra.mxu0 %v278_v22  ;;  %v441_v3 = vld [vmem:[%s1161_s7 + $0xc0] sm:$0xff] }
  0x55   :  { %v417_v22 = vld [vmem:[%s1161_s7] sm:$0xff] }
  0x56   :  { %405 = vmatpush.msra.mxu1 %v308_v15  ;;  %385 = vmatpush.msra.mxu0 %v276_v26  ;;  %v435_v15 = vld [vmem:[%s1161_s7 + $0x90] sm:$0xff] }
  0x58   :  { %406 = vmatpush.msra.mxu1 %v306_v19  ;;  %386 = vmatpush.msra.mxu0 %v274_v30  ;;  %v433_v19 = vld [vmem:[%s1161_s7 + $0x80] sm:$0xff] }
  0x5a   :  { %407 = vmatpush.msra.mxu1 %v304_v23  ;;  %387 = vmatpush.msra.mxu0 %v272_v34  ;;  %v329_v23 = vld [vmem:[%s1163_s6] sm:$0x3] }
  0x5b   :  { %v332_v24 = vperm.slane %v329_v23, 1  ;;  %v331_v29 = vperm.slane %v329_v23, 0 }
  0x5c   :  { %408 = vmatpush.msra.mxu1 %v302_v27  ;;  %388 = vmatpush.msra.mxu0 %v270_v37 }
  0x5e   :  { %409 = vmatpush.msra.mxu1 %v300_v31  ;;  %389 = vmatpush.msra.mxu0 %v268_v39 }
  0x60   :  { %410 = vmatpush.msra.mxu1 %v298_v35  ;;  %390 = vmatpush.msra.mxu0 %v266_v41 }
  0x9e   :  { %v88_v6 = vpop.f32.mrf.mxu0  ;;  %v108_v7 = vpop.f32.mrf.mxu1 }
  0x9f   :  { %v89_v8 = vadd.f32 %v88_v6, %v67_v4  ;;  %v109_v9 = vadd.f32 %v108_v7, %v68_v5  ;;  %v427_v4 = vld [vmem:[%s1161_s7 + $0x50] sm:$0xff]  ;;  %v440_v5 = vld [vmem:[%s1161_s7 + $0xb8] sm:$0xff]  ;;  %v426_v6 = vld [vmem:[%s1161_s7 + $0x48] sm:$0xff] }
  0xa0   :  { %v439_v7 = vld [vmem:[%s1161_s7 + $0xb0] sm:$0xff] }
  0xa1   :  { %500 = vtanh.f32 %v89_v8  ;;  %v425_v8 = vld [vmem:[%s1161_s7 + $0x40] sm:$0xff] }
  0xa2   :  { %502 = vtanh.f32 %v109_v9  ;;  %v438_v9 = vld [vmem:[%s1161_s7 + $0xa8] sm:$0xff] }
  0xa7   :  { %v501_v10 = vpop.eup %500 }
  0xa8   :  { %v503_v11 = vpop.eup %502  ;;  %199 = vmatmul.f32.vlgmr.msra.gmra.mxu2 %v501_v10  ;;  %239 = vmatmul.f32.vlgmr.msrb.gmra.mxu0 %v501_v10  ;;  %v424_v10 = vld [vmem:[%s1161_s7 + $0x38] sm:$0xff] }
  0xa9   :  { %219 = vmatmul.f32.vlgmr.msra.gmra.mxu3 %v503_v11  ;;  %259 = vmatmul.f32.vlgmr.msrb.gmra.mxu1 %v503_v11  ;;  %v437_v11 = vld [vmem:[%s1161_s7 + $0xa0] sm:$0xff] }
  0xaa   :  { %473 = vmatpush.msra.mxu3 %v448_v42  ;;  %453 = vmatpush.msra.mxu2 %v432_v44 }
  0xac   :  { %474 = vmatpush.msra.mxu3 %v447_v43  ;;  %454 = vmatpush.msra.mxu2 %v431_v45 }
  0xae   :  { %475 = vmatpush.msra.mxu3 %v446_v46  ;;  %455 = vmatpush.msra.mxu2 %v430_v47 }
  0xb0   :  { %476 = vmatpush.msra.mxu3 %v445_v48  ;;  %456 = vmatpush.msra.mxu2 %v429_v49 }
  0xb2   :  { %477 = vmatpush.msra.mxu3 %v444_v50  ;;  %457 = vmatpush.msra.mxu2 %v428_v2 }
  0xb4   :  { %478 = vmatpush.msra.mxu3 %v443_v52  ;;  %458 = vmatpush.msra.mxu2 %v427_v4 }
  0xb6   :  { %479 = vmatpush.msra.mxu3 %v442_v53  ;;  %459 = vmatpush.msra.mxu2 %v426_v6 }
  0xb8   :  { %480 = vmatpush.msra.mxu3 %v441_v3  ;;  %460 = vmatpush.msra.mxu2 %v425_v8 }
  0xba   :  { %481 = vmatpush.msra.mxu3 %v440_v5  ;;  %461 = vmatpush.msra.mxu2 %v424_v10 }
  0xbc   :  { %482 = vmatpush.msra.mxu3 %v439_v7  ;;  %462 = vmatpush.msra.mxu2 %v423_v12 }
  0xbe   :  { %483 = vmatpush.msra.mxu3 %v438_v9  ;;  %463 = vmatpush.msra.mxu2 %v422_v14 }
  0xc0   :  { %484 = vmatpush.msra.mxu3 %v437_v11  ;;  %464 = vmatpush.msra.mxu2 %v421_v16 }
  0xc2   :  { %485 = vmatpush.msra.mxu3 %v436_v13  ;;  %465 = vmatpush.msra.mxu2 %v420_v18 }
  0xc4   :  { %486 = vmatpush.msra.mxu3 %v435_v15  ;;  %466 = vmatpush.msra.mxu2 %v419_v20 }
  0xc6   :  { %487 = vmatpush.msra.mxu3 %v434_v17  ;;  %467 = vmatpush.msra.mxu2 %v418_v21 }
  0xc8   :  { %488 = vmatpush.msra.mxu3 %v433_v19  ;;  %468 = vmatpush.msra.mxu2 %v417_v22 }
 0x125   :  { %v240_v55 = vpop.f32.mrf.mxu0 }
 0x126   :  { %v241_v56 = vadd.f32 %v240_v55, %v180_v54  ;;  %v260_v57 = vpop.f32.mrf.mxu1 }
 0x128   :  { %v261_v58 = vadd.f32 %v260_v57, %v241_v56 }
 0x12a   :  { %504 = vtanh.f32 %v261_v58 }
 0x12b   :  { %v200_v60 = vpop.f32.mrf.mxu2 }
 0x12c   :  { %v201_v61 = vadd.f32 %v200_v60, %v179_v59  ;;  %v220_v62 = vpop.f32.mrf.mxu3 }
 0x12e   :  { %v221_v63 = vadd.f32 %v220_v62, %v201_v61 }
 0x130   :  { %v505_v0 = vpop.eup %504  ;;  %506 = vtanh.f32 %v221_v63 }
 0x131   :  { %371 = vmatmul.f32.vlgmr.msrb.gmra.mxu3 %v505_v0  ;;  %411 = vmatmul.f32.vlgmr.msra.gmra.mxu1 %v505_v0 }
 0x136   :  { %v507_v1 = vpop.eup %506 }
 0x137   :  { %351 = vmatmul.f32.vlgmr.msrb.gmra.mxu2 %v507_v1  ;;  %391 = vmatmul.f32.vlgmr.msra.gmra.mxu0 %v507_v1 }
 0x1ae   :  { %v412_v27 = vpop.f32.mrf.mxu1 }
 0x1b4   :  { %v392_v25 = vpop.f32.mrf.mxu0  ;;  %v372_v32 = vpop.f32.mrf.mxu3 }
 0x1b5   :  { %v393_v26 = vadd.f32 %v392_v25, %v332_v24 }
 0x1b7   :  { %v413_v28 = vadd.f32 %v412_v27, %v393_v26 }
 0x1b9   :  { %508 = vtanh.f32 %v413_v28 }
 0x1ba   :  { %v352_v30 = vpop.f32.mrf.mxu2 }
 0x1bb   :  { %v353_v31 = vadd.f32 %v352_v30, %v331_v29 }
 0x1bd   :  { %v373_v33 = vadd.f32 %v372_v32, %v353_v31 }
 0x1bf   :  { %v509_v34 = vpop.eup %508  ;;  %510 = vtanh.f32 %v373_v33 }
 0x1c0   :  { %489 = vmatmul.f32.vlgmr.msra.gmra.mxu3 %v509_v34 }
 0x1c5   :  { %v511_v35 = vpop.eup %510 }
 0x1c6   :  { %469 = vmatmul.f32.vlgmr.msra.gmra.mxu2 %v511_v35 }
 0x243   :  { %v490_v39 = vpop.f32.mrf.mxu3 }
 0x249   :  { %v470_v37 = vpop.f32.mrf.mxu2 }
 0x24a   :  { %v471_v38 = vadd.f32 %v499_v36, %v470_v37 }
 0x24c   :  { %v491_v40 = vadd.f32 %v490_v39, %v471_v38 }
 0x24e   :  { %494 = vst.msk [vmem:[%s1165_s9] sm:$0xff] %vm493_vm0, %v491_v40 }

</bundles_post_ra>
